<compile_context>
chip_gen: v6e
topology: v6e:2x2x1
jax: 0.10.0
libtpu: 0.0.40
codegen_flags: <defaults>
</compile_context>

<pallas_src>
import functools

import jax
import jax.numpy as jnp
from jax.experimental import pallas as pl
from jax.experimental.pallas import tpu as pltpu


def _mha_kernel(x_ref, wq_ref, wk_ref, wv_ref, wo_ref, bo_ref, o_ref, ctx_ref,
                *, bb: int, seq: int, num_heads: int, head_dim: int):
    d_out = num_heads * head_dim

    x = x_ref[...].astype(jnp.float32)                       # (bb*T, d_in)

    # Fused QKV projections over all bb*T rows (MXU).
    q = jnp.dot(x, wq_ref[...], preferred_element_type=jnp.float32)
    k = jnp.dot(x, wk_ref[...], preferred_element_type=jnp.float32)
    v = jnp.dot(x, wv_ref[...], preferred_element_type=jnp.float32)

    # Fold the softmax scale into q once.
    q = q * jnp.float32(1.0 / (head_dim ** 0.5))

    # Recover (bb, T, d_out) structure for per-sequence causal attention
    # (leading-dim split only; lane layout unchanged).
    q3 = q.reshape(bb, seq, d_out)
    k3 = k.reshape(bb, seq, d_out)
    v3 = v.reshape(bb, seq, d_out)

    # Causal mask: torch.triu(ones, diagonal=1) masks j > i.
    row = jax.lax.broadcasted_iota(jnp.int32, (seq, seq), 0)
    col = jax.lax.broadcasted_iota(jnp.int32, (seq, seq), 1)
    keep = (col <= row)[None]                                # (1, T, T)
    neg_big = jnp.float32(-1e30)                             # finite, NaN-safe

    # Small static loop over heads; heads are contiguous lane slices of width
    # head_dim.  Each head's context goes straight into the VMEM scratch.
    for h in range(num_heads):
        lo = h * head_dim
        qh = q3[:, :, lo:lo + head_dim]                      # (bb, T, hd)
        kh = k3[:, :, lo:lo + head_dim]
        vh = v3[:, :, lo:lo + head_dim]

        s = jnp.einsum("bqd,bkd->bqk", qh, kh,
                       preferred_element_type=jnp.float32)   # (bb, T, T)
        s = jnp.where(keep, s, neg_big)

        # Numerically-stable softmax over the last dim.
        m = jnp.max(s, axis=-1, keepdims=True)
        p = jnp.exp(s - m)
        denom = jnp.sum(p, axis=-1, keepdims=True)
        w = p * pl.reciprocal(denom, approx=True)            # EUP slot, not VALU

        # TODO(synk): training-mode dropout on attention weights not implemented
        # (nn.Dropout is identity in eval mode, which is what we reproduce here).

        ctx_h = jnp.einsum("bqk,bkd->bqd", w, vh,
                           preferred_element_type=jnp.float32)  # (bb, T, hd)
        ctx_ref[:, lo:lo + head_dim] = ctx_h.reshape(bb * seq, head_dim)

    # Output projection + bias over all bb*T rows (MXU).
    out = jnp.dot(ctx_ref[...], wo_ref[...],
                  preferred_element_type=jnp.float32) + bo_ref[...]
    o_ref[...] = out.astype(o_ref.dtype)


def multi_head_attention(x, wq, wk, wv, wo, bo, *, num_heads: int):
    """x: (B, T, d_in); wq/wk/wv: (d_in, d_out); wo: (d_out, d_out); bo: (1, d_out)."""
    B, T, d_in = x.shape
    d_out = wq.shape[1]
    head_dim = d_out // num_heads

    # Batch fusion: largest divisor of B such that bb*T rows form a reasonable
    # MXU slab (<= 512 rows) and the row count stays sublane-aligned.  With the
    # toy shapes (B=2, T=8) this fuses the whole batch into one grid step.
    bb = 1
    for cand in range(1, B + 1):
        if B % cand == 0 and cand * T <= 512 and ((cand * T) % 8 == 0 or cand == B):
            bb = cand
    grid = (B // bb,)

    # 2-D row-slab views so the kernel never does minor-dim reshapes; the
    # wrapper-side reshapes are free XLA ops.
    x2 = x.reshape(B * T, d_in)

    kernel = functools.partial(_mha_kernel, bb=bb, seq=T,
                               num_heads=num_heads, head_dim=head_dim)

    flops = (2 * B * T * d_in * d_out * 3                       # QKV projections
             + 2 * B * num_heads * T * T * head_dim * 2         # scores + context
             + 2 * B * T * d_out * d_out)                       # output projection
    transcendentals = B * num_heads * T * (T + 1)               # exp + reciprocal
    bytes_accessed = 4 * (B * T * d_in + 3 * d_in * d_out
                          + d_out * d_out + d_out + B * T * d_out)

    out2 = pl.pallas_call(
        kernel,
        out_shape=jax.ShapeDtypeStruct((B * T, d_out), x.dtype),
        grid_spec=pltpu.PrefetchScalarGridSpec(
            num_scalar_prefetch=0,
            grid=grid,
            in_specs=[
                pl.BlockSpec((bb * T, d_in), lambda b: (b, 0)),   # x rows
                pl.BlockSpec((d_in, d_out), lambda b: (0, 0)),    # W_query
                pl.BlockSpec((d_in, d_out), lambda b: (0, 0)),    # W_key
                pl.BlockSpec((d_in, d_out), lambda b: (0, 0)),    # W_value
                pl.BlockSpec((d_out, d_out), lambda b: (0, 0)),   # out_proj weight
                pl.BlockSpec((1, d_out), lambda b: (0, 0)),       # out_proj bias
            ],
            out_specs=pl.BlockSpec((bb * T, d_out), lambda b: (b, 0)),
            scratch_shapes=[pltpu.VMEM((bb * T, d_out), jnp.float32)],
        ),
        compiler_params=pltpu.CompilerParams(
            dimension_semantics=("parallel",)),
        cost_estimate=pl.CostEstimate(flops=flops,
                                      transcendentals=transcendentals,
                                      bytes_accessed=bytes_accessed),
    )(x2, wq, wk, wv, wo, bo)

    # TODO(synk): for long sequences (esp. v7x's 64 MiB VMEM) the whole-sequence
    # softmax should become flash-style KV-tiled with online-softmax scratch.
    return out2.reshape(B, T, d_out)


def _reference(x, wq, wk, wv, wo, bo, *, num_heads: int):
    """Pure-JAX reference mirroring the PyTorch forward (eval mode)."""
    B, T, d_in = x.shape
    d_out = wq.shape[1]
    hd = d_out // num_heads
    q = (x @ wq).reshape(B, T, num_heads, hd).transpose(0, 2, 1, 3)
    k = (x @ wk).reshape(B, T, num_heads, hd).transpose(0, 2, 1, 3)
    v = (x @ wv).reshape(B, T, num_heads, hd).transpose(0, 2, 1, 3)
    s = jnp.einsum("bhqd,bhkd->bhqk", q, k)
    mask = jnp.triu(jnp.ones((T, T), dtype=bool), k=1)
    s = jnp.where(mask[None, None], -jnp.inf, s)
    w = jax.nn.softmax(s / (hd ** 0.5), axis=-1)
    ctx = jnp.einsum("bhqk,bhkd->bhqd", w, v).transpose(0, 2, 1, 3).reshape(B, T, d_out)
    return ctx @ wo + bo


if __name__ == "__main__":
    # Module config (small, consistent with the forward):
    #   d_in=32, d_out=32, context_length=8, dropout=0.1 (eval), num_heads=4
    B, T, d_in, d_out, num_heads = 2, 8, 32, 32, 4

    key = jax.random.PRNGKey(0)
    kx, kq, kk, kv, ko, kb = jax.random.split(key, 6)

    x  = jax.random.normal(kx, (B, T, d_in), dtype=jnp.float32)
    # nn.Linear weights, stored pre-transposed as (in, out); qkv_bias=False.
    wq = jax.random.normal(kq, (d_in, d_out), dtype=jnp.float32) * 0.1
    wk = jax.random.normal(kk, (d_in, d_out), dtype=jnp.float32) * 0.1
    wv = jax.random.normal(kv, (d_in, d_out), dtype=jnp.float32) * 0.1
    wo = jax.random.normal(ko, (d_out, d_out), dtype=jnp.float32) * 0.1
    bo = jax.random.normal(kb, (1, d_out), dtype=jnp.float32) * 0.1

    out = multi_head_attention(x, wq, wk, wv, wo, bo, num_heads=num_heads)
    out = jax.block_until_ready(out)

    ref = _reference(x, wq, wk, wv, wo, bo, num_heads=num_heads)
    assert out.shape == (B, T, d_out)
    # Slightly looser tolerance than before: the softmax denominator now uses the
    # EUP approximate reciprocal (~2^-12 relative error).
    assert jnp.allclose(out, ref, atol=2e-3, rtol=2e-3), "mismatch vs reference"

    print("KERNEL_OK")
</pallas_src>

<mosaic_0001>
module attributes {stable_mosaic.version = 11 : i64} {
  func.func @_mha_kernel(%arg0: i32, %arg1: memref<16x32xf32, #tpu.memory_space<vmem>>, %arg2: memref<32x32xf32, #tpu.memory_space<vmem>>, %arg3: memref<32x32xf32, #tpu.memory_space<vmem>>, %arg4: memref<32x32xf32, #tpu.memory_space<vmem>>, %arg5: memref<32x32xf32, #tpu.memory_space<vmem>>, %arg6: memref<1x32xf32, #tpu.memory_space<vmem>>, %arg7: memref<16x32xf32, #tpu.memory_space<vmem>>, %arg8: memref<16x32xf32, #tpu.memory_space<vmem>>) attributes {dimension_semantics = [#tpu.dimension_semantics<parallel>], iteration_bounds = array<i64: 1>, scalar_prefetch = 0 : i64, scratch_operands = 1 : i64, tpu.core_type = #tpu.core_type<tc>, window_params = [{transform_indices = @transform_0, window_bounds = array<i64: 16, 32>}, {pipeline_mode = #tpu.pipeline_mode<synchronous>, transform_indices = @transform_1, window_bounds = array<i64: 32, 32>}, {pipeline_mode = #tpu.pipeline_mode<synchronous>, transform_indices = @transform_2, window_bounds = array<i64: 32, 32>}, {pipeline_mode = #tpu.pipeline_mode<synchronous>, transform_indices = @transform_3, window_bounds = array<i64: 32, 32>}, {pipeline_mode = #tpu.pipeline_mode<synchronous>, transform_indices = @transform_4, window_bounds = array<i64: 32, 32>}, {pipeline_mode = #tpu.pipeline_mode<synchronous>, transform_indices = @transform_5, window_bounds = array<i64: 1, 32>}, {transform_indices = @transform_6, window_bounds = array<i64: 16, 32>}]} {
    %c0 = arith.constant 0 : index
    %c0_0 = arith.constant 0 : index
    %0 = vector.load %arg1[%c0, %c0_0] : memref<16x32xf32, #tpu.memory_space<vmem>>, vector<16x32xf32>
    %c0_1 = arith.constant 0 : index
    %c0_2 = arith.constant 0 : index
    %1 = vector.load %arg2[%c0_1, %c0_2] : memref<32x32xf32, #tpu.memory_space<vmem>>, vector<32x32xf32>
    %cst = arith.constant dense<0.000000e+00> : vector<16x32xf32>
    %2 = tpu.matmul %0, %1, %cst {dimension_numbers = #tpu.dot_dimension_numbers<[1], [0], [0], [1], [0, 0, 1, 1], [], []>} : vector<16x32xf32>, vector<32x32xf32>, vector<16x32xf32> -> vector<16x32xf32>
    %c0_3 = arith.constant 0 : index
    %c0_4 = arith.constant 0 : index
    %3 = vector.load %arg3[%c0_3, %c0_4] : memref<32x32xf32, #tpu.memory_space<vmem>>, vector<32x32xf32>
    %cst_5 = arith.constant dense<0.000000e+00> : vector<16x32xf32>
    %4 = tpu.matmul %0, %3, %cst_5 {dimension_numbers = #tpu.dot_dimension_numbers<[1], [0], [0], [1], [0, 0, 1, 1], [], []>} : vector<16x32xf32>, vector<32x32xf32>, vector<16x32xf32> -> vector<16x32xf32>
    %c0_6 = arith.constant 0 : index
    %c0_7 = arith.constant 0 : index
    %5 = vector.load %arg4[%c0_6, %c0_7] : memref<32x32xf32, #tpu.memory_space<vmem>>, vector<32x32xf32>
    %cst_8 = arith.constant dense<0.000000e+00> : vector<16x32xf32>
    %6 = tpu.matmul %0, %5, %cst_8 {dimension_numbers = #tpu.dot_dimension_numbers<[1], [0], [0], [1], [0, 0, 1, 1], [], []>} : vector<16x32xf32>, vector<32x32xf32>, vector<16x32xf32> -> vector<16x32xf32>
    %cst_9 = arith.constant 0.353553385 : f32
    %7 = vector.broadcast %cst_9 : f32 to vector<16x32xf32>
    %8 = arith.mulf %2, %7 : vector<16x32xf32>
    %9 = vector.shape_cast %8 : vector<16x32xf32> to vector<2x8x32xf32>
    %10 = vector.shape_cast %4 : vector<16x32xf32> to vector<2x8x32xf32>
    %11 = vector.shape_cast %6 : vector<16x32xf32> to vector<2x8x32xf32>
    %12 = tpu.iota {dimensions = array<i32: 0>} : vector<8x8xi32>
    %13 = tpu.iota {dimensions = array<i32: 1>} : vector<8x8xi32>
    %14 = arith.cmpi sle, %13, %12 : vector<8x8xi32>
    %15 = vector.shape_cast %14 : vector<8x8xi1> to vector<1x8x8xi1>
    %16 = vector.extract_strided_slice %9 {offsets = [0, 0, 0], sizes = [2, 8, 8], strides = [1, 1, 1]} : vector<2x8x32xf32> to vector<2x8x8xf32>
    %17 = vector.extract_strided_slice %10 {offsets = [0, 0, 0], sizes = [2, 8, 8], strides = [1, 1, 1]} : vector<2x8x32xf32> to vector<2x8x8xf32>
    %18 = vector.extract_strided_slice %11 {offsets = [0, 0, 0], sizes = [2, 8, 8], strides = [1, 1, 1]} : vector<2x8x32xf32> to vector<2x8x8xf32>
    "tpu.trace_start"() <{level = 10 : i32, message = "bqd,bkd->bqk"}> : () -> ()
    %cst_10 = arith.constant dense<0.000000e+00> : vector<2x8x8xf32>
    %19 = tpu.matmul %16, %17, %cst_10 {dimension_numbers = #tpu.dot_dimension_numbers<[2], [2], [1], [1], [0, 0, 0, 1, 1, 1], [0], [0]>} : vector<2x8x8xf32>, vector<2x8x8xf32>, vector<2x8x8xf32> -> vector<2x8x8xf32>
    %cst_11 = arith.constant -1.000000e+30 : f32
    "tpu.trace_stop"() : () -> ()
    %20 = vector.shape_cast %15 : vector<1x8x8xi1> to vector<1x8x8xi1>
    %21 = vector.broadcast %20 : vector<1x8x8xi1> to vector<2x8x8xi1>
    %22 = vector.broadcast %cst_11 : f32 to vector<2x8x8xf32>
    %23 = arith.select %21, %19, %22 : vector<2x8x8xi1>, vector<2x8x8xf32>
    %cst_12 = arith.constant dense<0xFF800000> : vector<2x8xf32>
    %24 = vector.multi_reduction <maximumf>, %23, %cst_12 [2] : vector<2x8x8xf32> to vector<2x8xf32>
    %25 = vector.shape_cast %24 : vector<2x8xf32> to vector<2x8x1xf32>
    %26 = vector.broadcast %25 : vector<2x8x1xf32> to vector<2x8x8xf32>
    %27 = arith.subf %23, %26 : vector<2x8x8xf32>
    %28 = math.exp %27 : vector<2x8x8xf32>
    %cst_13 = arith.constant dense<0.000000e+00> : vector<2x8xf32>
    %29 = vector.multi_reduction <add>, %28, %cst_13 [2] : vector<2x8x8xf32> to vector<2x8xf32>
    %30 = vector.shape_cast %29 : vector<2x8xf32> to vector<2x8x1xf32>
    %31 = tpu.reciprocal %30 {approx = true} : vector<2x8x1xf32> -> vector<2x8x1xf32>
    %32 = vector.broadcast %31 : vector<2x8x1xf32> to vector<2x8x8xf32>
    %33 = arith.mulf %28, %32 : vector<2x8x8xf32>
    "tpu.trace_start"() <{level = 10 : i32, message = "bqk,bkd->bqd"}> : () -> ()
    %cst_14 = arith.constant dense<0.000000e+00> : vector<2x8x8xf32>
    %34 = tpu.matmul %33, %18, %cst_14 {dimension_numbers = #tpu.dot_dimension_numbers<[2], [1], [1], [2], [0, 0, 0, 1, 1, 2], [0], [0]>} : vector<2x8x8xf32>, vector<2x8x8xf32>, vector<2x8x8xf32> -> vector<2x8x8xf32>
    "tpu.trace_stop"() : () -> ()
    %35 = vector.shape_cast %34 : vector<2x8x8xf32> to vector<16x8xf32>
    %c0_15 = arith.constant 0 : index
    %c0_16 = arith.constant 0 : index
    %36 = vector.load %arg8[%c0_15, %c0_16] : memref<16x32xf32, #tpu.memory_space<vmem>>, vector<16x8xf32>
    tpu.vector_store %arg8[%c0_15, %c0_16], %35 {strides = array<i32>} : memref<16x32xf32, #tpu.memory_space<vmem>>, vector<16x8xf32>,
    %37 = vector.extract_strided_slice %9 {offsets = [0, 0, 8], sizes = [2, 8, 8], strides = [1, 1, 1]} : vector<2x8x32xf32> to vector<2x8x8xf32>
    %38 = vector.extract_strided_slice %10 {offsets = [0, 0, 8], sizes = [2, 8, 8], strides = [1, 1, 1]} : vector<2x8x32xf32> to vector<2x8x8xf32>
    %39 = vector.extract_strided_slice %11 {offsets = [0, 0, 8], sizes = [2, 8, 8], strides = [1, 1, 1]} : vector<2x8x32xf32> to vector<2x8x8xf32>
    "tpu.trace_start"() <{level = 10 : i32, message = "bqd,bkd->bqk"}> : () -> ()
    %cst_17 = arith.constant dense<0.000000e+00> : vector<2x8x8xf32>
    %40 = tpu.matmul %37, %38, %cst_17 {dimension_numbers = #tpu.dot_dimension_numbers<[2], [2], [1], [1], [0, 0, 0, 1, 1, 1], [0], [0]>} : vector<2x8x8xf32>, vector<2x8x8xf32>, vector<2x8x8xf32> -> vector<2x8x8xf32>
    %cst_18 = arith.constant -1.000000e+30 : f32
    "tpu.trace_stop"() : () -> ()
    %41 = vector.shape_cast %15 : vector<1x8x8xi1> to vector<1x8x8xi1>
    %42 = vector.broadcast %41 : vector<1x8x8xi1> to vector<2x8x8xi1>
    %43 = vector.broadcast %cst_18 : f32 to vector<2x8x8xf32>
    %44 = arith.select %42, %40, %43 : vector<2x8x8xi1>, vector<2x8x8xf32>
    %cst_19 = arith.constant dense<0xFF800000> : vector<2x8xf32>
    %45 = vector.multi_reduction <maximumf>, %44, %cst_19 [2] : vector<2x8x8xf32> to vector<2x8xf32>
    %46 = vector.shape_cast %45 : vector<2x8xf32> to vector<2x8x1xf32>
    %47 = vector.broadcast %46 : vector<2x8x1xf32> to vector<2x8x8xf32>
    %48 = arith.subf %44, %47 : vector<2x8x8xf32>
    %49 = math.exp %48 : vector<2x8x8xf32>
    %cst_20 = arith.constant dense<0.000000e+00> : vector<2x8xf32>
    %50 = vector.multi_reduction <add>, %49, %cst_20 [2] : vector<2x8x8xf32> to vector<2x8xf32>
    %51 = vector.shape_cast %50 : vector<2x8xf32> to vector<2x8x1xf32>
    %52 = tpu.reciprocal %51 {approx = true} : vector<2x8x1xf32> -> vector<2x8x1xf32>
    %53 = vector.broadcast %52 : vector<2x8x1xf32> to vector<2x8x8xf32>
    %54 = arith.mulf %49, %53 : vector<2x8x8xf32>
    "tpu.trace_start"() <{level = 10 : i32, message = "bqk,bkd->bqd"}> : () -> ()
    %cst_21 = arith.constant dense<0.000000e+00> : vector<2x8x8xf32>
    %55 = tpu.matmul %54, %39, %cst_21 {dimension_numbers = #tpu.dot_dimension_numbers<[2], [1], [1], [2], [0, 0, 0, 1, 1, 2], [0], [0]>} : vector<2x8x8xf32>, vector<2x8x8xf32>, vector<2x8x8xf32> -> vector<2x8x8xf32>
    "tpu.trace_stop"() : () -> ()
    %56 = vector.shape_cast %55 : vector<2x8x8xf32> to vector<16x8xf32>
    %c0_22 = arith.constant 0 : index
    %c8 = arith.constant 8 : index
    %57 = vector.load %arg8[%c0_22, %c8] : memref<16x32xf32, #tpu.memory_space<vmem>>, vector<16x8xf32>
    tpu.vector_store %arg8[%c0_22, %c8], %56 {strides = array<i32>} : memref<16x32xf32, #tpu.memory_space<vmem>>, vector<16x8xf32>,
    %58 = vector.extract_strided_slice %9 {offsets = [0, 0, 16], sizes = [2, 8, 8], strides = [1, 1, 1]} : vector<2x8x32xf32> to vector<2x8x8xf32>
    %59 = vector.extract_strided_slice %10 {offsets = [0, 0, 16], sizes = [2, 8, 8], strides = [1, 1, 1]} : vector<2x8x32xf32> to vector<2x8x8xf32>
    %60 = vector.extract_strided_slice %11 {offsets = [0, 0, 16], sizes = [2, 8, 8], strides = [1, 1, 1]} : vector<2x8x32xf32> to vector<2x8x8xf32>
    "tpu.trace_start"() <{level = 10 : i32, message = "bqd,bkd->bqk"}> : () -> ()
    %cst_23 = arith.constant dense<0.000000e+00> : vector<2x8x8xf32>
    %61 = tpu.matmul %58, %59, %cst_23 {dimension_numbers = #tpu.dot_dimension_numbers<[2], [2], [1], [1], [0, 0, 0, 1, 1, 1], [0], [0]>} : vector<2x8x8xf32>, vector<2x8x8xf32>, vector<2x8x8xf32> -> vector<2x8x8xf32>
    %cst_24 = arith.constant -1.000000e+30 : f32
    "tpu.trace_stop"() : () -> ()
    %62 = vector.shape_cast %15 : vector<1x8x8xi1> to vector<1x8x8xi1>
    %63 = vector.broadcast %62 : vector<1x8x8xi1> to vector<2x8x8xi1>
    %64 = vector.broadcast %cst_24 : f32 to vector<2x8x8xf32>
    %65 = arith.select %63, %61, %64 : vector<2x8x8xi1>, vector<2x8x8xf32>
    %cst_25 = arith.constant dense<0xFF800000> : vector<2x8xf32>
    %66 = vector.multi_reduction <maximumf>, %65, %cst_25 [2] : vector<2x8x8xf32> to vector<2x8xf32>
    %67 = vector.shape_cast %66 : vector<2x8xf32> to vector<2x8x1xf32>
    %68 = vector.broadcast %67 : vector<2x8x1xf32> to vector<2x8x8xf32>
    %69 = arith.subf %65, %68 : vector<2x8x8xf32>
    %70 = math.exp %69 : vector<2x8x8xf32>
    %cst_26 = arith.constant dense<0.000000e+00> : vector<2x8xf32>
    %71 = vector.multi_reduction <add>, %70, %cst_26 [2] : vector<2x8x8xf32> to vector<2x8xf32>
    %72 = vector.shape_cast %71 : vector<2x8xf32> to vector<2x8x1xf32>
    %73 = tpu.reciprocal %72 {approx = true} : vector<2x8x1xf32> -> vector<2x8x1xf32>
    %74 = vector.broadcast %73 : vector<2x8x1xf32> to vector<2x8x8xf32>
    %75 = arith.mulf %70, %74 : vector<2x8x8xf32>
    "tpu.trace_start"() <{level = 10 : i32, message = "bqk,bkd->bqd"}> : () -> ()
    %cst_27 = arith.constant dense<0.000000e+00> : vector<2x8x8xf32>
    %76 = tpu.matmul %75, %60, %cst_27 {dimension_numbers = #tpu.dot_dimension_numbers<[2], [1], [1], [2], [0, 0, 0, 1, 1, 2], [0], [0]>} : vector<2x8x8xf32>, vector<2x8x8xf32>, vector<2x8x8xf32> -> vector<2x8x8xf32>
    "tpu.trace_stop"() : () -> ()
    %77 = vector.shape_cast %76 : vector<2x8x8xf32> to vector<16x8xf32>
    %c0_28 = arith.constant 0 : index
    %c16 = arith.constant 16 : index
    %78 = vector.load %arg8[%c0_28, %c16] : memref<16x32xf32, #tpu.memory_space<vmem>>, vector<16x8xf32>
    tpu.vector_store %arg8[%c0_28, %c16], %77 {strides = array<i32>} : memref<16x32xf32, #tpu.memory_space<vmem>>, vector<16x8xf32>,
    %79 = vector.extract_strided_slice %9 {offsets = [0, 0, 24], sizes = [2, 8, 8], strides = [1, 1, 1]} : vector<2x8x32xf32> to vector<2x8x8xf32>
    %80 = vector.extract_strided_slice %10 {offsets = [0, 0, 24], sizes = [2, 8, 8], strides = [1, 1, 1]} : vector<2x8x32xf32> to vector<2x8x8xf32>
    %81 = vector.extract_strided_slice %11 {offsets = [0, 0, 24], sizes = [2, 8, 8], strides = [1, 1, 1]} : vector<2x8x32xf32> to vector<2x8x8xf32>
    "tpu.trace_start"() <{level = 10 : i32, message = "bqd,bkd->bqk"}> : () -> ()
    %cst_29 = arith.constant dense<0.000000e+00> : vector<2x8x8xf32>
    %82 = tpu.matmul %79, %80, %cst_29 {dimension_numbers = #tpu.dot_dimension_numbers<[2], [2], [1], [1], [0, 0, 0, 1, 1, 1], [0], [0]>} : vector<2x8x8xf32>, vector<2x8x8xf32>, vector<2x8x8xf32> -> vector<2x8x8xf32>
    %cst_30 = arith.constant -1.000000e+30 : f32
    "tpu.trace_stop"() : () -> ()
    %83 = vector.shape_cast %15 : vector<1x8x8xi1> to vector<1x8x8xi1>
    %84 = vector.broadcast %83 : vector<1x8x8xi1> to vector<2x8x8xi1>
    %85 = vector.broadcast %cst_30 : f32 to vector<2x8x8xf32>
    %86 = arith.select %84, %82, %85 : vector<2x8x8xi1>, vector<2x8x8xf32>
    %cst_31 = arith.constant dense<0xFF800000> : vector<2x8xf32>
    %87 = vector.multi_reduction <maximumf>, %86, %cst_31 [2] : vector<2x8x8xf32> to vector<2x8xf32>
    %88 = vector.shape_cast %87 : vector<2x8xf32> to vector<2x8x1xf32>
    %89 = vector.broadcast %88 : vector<2x8x1xf32> to vector<2x8x8xf32>
    %90 = arith.subf %86, %89 : vector<2x8x8xf32>
    %91 = math.exp %90 : vector<2x8x8xf32>
    %cst_32 = arith.constant dense<0.000000e+00> : vector<2x8xf32>
    %92 = vector.multi_reduction <add>, %91, %cst_32 [2] : vector<2x8x8xf32> to vector<2x8xf32>
    %93 = vector.shape_cast %92 : vector<2x8xf32> to vector<2x8x1xf32>
    %94 = tpu.reciprocal %93 {approx = true} : vector<2x8x1xf32> -> vector<2x8x1xf32>
    %95 = vector.broadcast %94 : vector<2x8x1xf32> to vector<2x8x8xf32>
    %96 = arith.mulf %91, %95 : vector<2x8x8xf32>
    "tpu.trace_start"() <{level = 10 : i32, message = "bqk,bkd->bqd"}> : () -> ()
    %cst_33 = arith.constant dense<0.000000e+00> : vector<2x8x8xf32>
    %97 = tpu.matmul %96, %81, %cst_33 {dimension_numbers = #tpu.dot_dimension_numbers<[2], [1], [1], [2], [0, 0, 0, 1, 1, 2], [0], [0]>} : vector<2x8x8xf32>, vector<2x8x8xf32>, vector<2x8x8xf32> -> vector<2x8x8xf32>
    "tpu.trace_stop"() : () -> ()
    %98 = vector.shape_cast %97 : vector<2x8x8xf32> to vector<16x8xf32>
    %c0_34 = arith.constant 0 : index
    %c24 = arith.constant 24 : index
    %99 = vector.load %arg8[%c0_34, %c24] : memref<16x32xf32, #tpu.memory_space<vmem>>, vector<16x8xf32>
    tpu.vector_store %arg8[%c0_34, %c24], %98 {strides = array<i32>} : memref<16x32xf32, #tpu.memory_space<vmem>>, vector<16x8xf32>,
    %c0_35 = arith.constant 0 : index
    %c0_36 = arith.constant 0 : index
    %100 = vector.load %arg8[%c0_35, %c0_36] : memref<16x32xf32, #tpu.memory_space<vmem>>, vector<16x32xf32>
    %c0_37 = arith.constant 0 : index
    %c0_38 = arith.constant 0 : index
    %101 = vector.load %arg5[%c0_37, %c0_38] : memref<32x32xf32, #tpu.memory_space<vmem>>, vector<32x32xf32>
    %cst_39 = arith.constant dense<0.000000e+00> : vector<16x32xf32>
    %102 = tpu.matmul %100, %101, %cst_39 {dimension_numbers = #tpu.dot_dimension_numbers<[1], [0], [0], [1], [0, 0, 1, 1], [], []>} : vector<16x32xf32>, vector<32x32xf32>, vector<16x32xf32> -> vector<16x32xf32>
    %c0_40 = arith.constant 0 : index
    %c0_41 = arith.constant 0 : index
    %103 = vector.load %arg6[%c0_40, %c0_41] : memref<1x32xf32, #tpu.memory_space<vmem>>, vector<1x32xf32>
    %104 = vector.broadcast %103 : vector<1x32xf32> to vector<16x32xf32>
    %105 = arith.addf %102, %104 : vector<16x32xf32>
    %c0_42 = arith.constant 0 : index
    %c0_43 = arith.constant 0 : index
    %106 = vector.load %arg7[%c0_42, %c0_43] : memref<16x32xf32, #tpu.memory_space<vmem>>, vector<16x32xf32>
    tpu.vector_store %arg7[%c0_42, %c0_43], %105 {strides = array<i32>} : memref<16x32xf32, #tpu.memory_space<vmem>>, vector<16x32xf32>,
    return
  }
  func.func @transform_0(%arg0: i32) -> (i32, i32) {
    %c0_i32 = arith.constant 0 : i32
    %c0_i32_0 = arith.constant 0 : i32
    return %arg0, %c0_i32 : i32, i32
  }
  func.func @transform_1(%arg0: i32) -> (i32, i32) {
    %c0_i32 = arith.constant 0 : i32
    %c0_i32_0 = arith.constant 0 : i32
    %c0_i32_1 = arith.constant 0 : i32
    return %c0_i32, %c0_i32_0 : i32, i32
  }
  func.func @transform_2(%arg0: i32) -> (i32, i32) {
    %c0_i32 = arith.constant 0 : i32
    %c0_i32_0 = arith.constant 0 : i32
    %c0_i32_1 = arith.constant 0 : i32
    return %c0_i32, %c0_i32_0 : i32, i32
  }
  func.func @transform_3(%arg0: i32) -> (i32, i32) {
    %c0_i32 = arith.constant 0 : i32
    %c0_i32_0 = arith.constant 0 : i32
    %c0_i32_1 = arith.constant 0 : i32
    return %c0_i32, %c0_i32_0 : i32, i32
  }
  func.func @transform_4(%arg0: i32) -> (i32, i32) {
    %c0_i32 = arith.constant 0 : i32
    %c0_i32_0 = arith.constant 0 : i32
    %c0_i32_1 = arith.constant 0 : i32
    return %c0_i32, %c0_i32_0 : i32, i32
  }
  func.func @transform_5(%arg0: i32) -> (i32, i32) {
    %c0_i32 = arith.constant 0 : i32
    %c0_i32_0 = arith.constant 0 : i32
    %c0_i32_1 = arith.constant 0 : i32
    return %c0_i32, %c0_i32_0 : i32, i32
  }
  func.func @transform_6(%arg0: i32) -> (i32, i32) {
    %c0_i32 = arith.constant 0 : i32
    %c0_i32_0 = arith.constant 0 : i32
    return %arg0, %c0_i32 : i32, i32
  }
}

</mosaic_0001>

<bundles_post_ra>
// kernel: tpu_custom_call.1
= control target key start
LH: loop header
LB: loop body
LE: loop exit
PB: predicated region body
PF: predicated region fallthrough
CT: control target
= control target key end

     0   :  { %11 = vsyncpa [#allocation4], 0  ;;  %s2479_s0 = inlined_call_operand.hbm [shape: f32[16,32], index: 0, kind: input, shape index: {}]   ;;  %s2480_s1 = inlined_call_operand.hbm [shape: f32[32,32], index: 1, kind: input, shape index: {}]   ;;  %s2481_s2 = inlined_call_operand.hbm [shape: f32[32,32], index: 2, kind: input, shape index: {}]   ;;  %s2482_s3 = inlined_call_operand.hbm [shape: f32[32,32], index: 3, kind: input, shape index: {}]   ;;  %s2483_s4 = inlined_call_operand.hbm [shape: f32[32,32], index: 4, kind: input, shape index: {}]   ;;  %s2484_s5 = inlined_call_operand.vmem [shape: f32[1,32], index: 5, kind: input, shape index: {}]   ;;  %s2485_s6 = inlined_call_operand.hbm [shape: f32[16,32], index: 6, kind: output, shape index: {}]  }
   0x1   :  { %12 = vsyncpa [#allocation7], 0 }
   0x2   :  { %13 = vsyncpa [#allocation10], 0 }
   0x3   :  { %14 = vsyncpa [#allocation5], 0  ;;  %s2206_s21 = smov [#allocation6]   ;;  %s2207_s23 = smov [#allocation9]  }
   0x4   :  { %s32_s22 = sshll.u32 %s2206_s21, 4  ;;  %s56_s24 = sshll.u32 %s2207_s23, 4  ;;  %s33_s22 = int_to_ptr.vmem [resolvable:$true] %s32_s22  ;;  %s57_s24 = int_to_ptr.vmem [resolvable:$true] %s56_s24 }
   0x5   :  { %s2086_s25 = scalar_lea.vmem %s33_s22, 512  ;;  %p2091_p1 = scmp.lt.s32.totalorder %s33_s22, %s33_s22 }
   0x6   :  { %p2087_p0 = scmp.ne.s32.totalorder %s33_s22, %s2086_s25  ;;  %p2092_p2 = scmp.lt.s32.totalorder %s2086_s25, %s2086_s25 }
   0x8   :  { %p2093_p3 = por %p2092_p2, %p2091_p1 }
   0xa   :  { %p2094_p4 = pnand %p2093_p3, %p2087_p0 }
   0xc   :  { %2097 = shalt.err (!%p2094_p4)
}
   0xd   :  { %s2208_s26 = smov 128   ;;  %s2209_s27 = smov 8  }
   0xe   :  { %38 = dma.hbm_to_vmem [thread:$0]  %s2480_s1, 512, %s33_s22, [#allocation7], %s2208_s26, %s2208_s26, %s2209_s27  }
   0xf   :  { %s2106_s30 = scalar_lea.vmem %s57_s24, 512  ;;  %p2111_p6 = scmp.lt.s32.totalorder %s57_s24, %s57_s24 }
  0x10   :  { %p2107_p5 = scmp.ne.s32.totalorder %s57_s24, %s2106_s30  ;;  %p2112_p7 = scmp.lt.s32.totalorder %s2106_s30, %s2106_s30 }
  0x12   :  { %p2113_p8 = por %p2112_p7, %p2111_p6 }
  0x14   :  { %p2114_p9 = pnand %p2113_p8, %p2107_p5 }
  0x16   :  { %2117 = shalt.err (!%p2114_p9)
}
  0x17   :  { %62 = dma.hbm_to_vmem [thread:$0]  %s2482_s3, 512, %s57_s24, [#allocation10], %s2208_s26, %s2208_s26, %s2209_s27  }
  0x18   :  { %s2210_s9 = smov [#allocation3]   ;;  %s2211_s11 = smov [#allocation8]  }
  0x19   :  { %s20_s10 = sshll.u32 %s2210_s9, 4  ;;  %s44_s12 = sshll.u32 %s2211_s11, 4  ;;  %s21_s10 = int_to_ptr.vmem [resolvable:$true] %s20_s10  ;;  %s45_s12 = int_to_ptr.vmem [resolvable:$true] %s44_s12 }
  0x1a   :  { %s2126_s1 = scalar_lea.vmem %s21_s10, 256  ;;  %p2131_p11 = scmp.lt.s32.totalorder %s21_s10, %s21_s10 }
  0x1b   :  { %p2127_p10 = scmp.ne.s32.totalorder %s21_s10, %s2126_s1  ;;  %p2132_p12 = scmp.lt.s32.totalorder %s2126_s1, %s2126_s1 }
  0x1d   :  { %p2133_p13 = por %p2132_p12, %p2131_p11 }
  0x1f   :  { %p2134_p0 = pnand %p2133_p13, %p2127_p10 }
  0x21   :  { %2137 = shalt.err (!%p2134_p0)
}
  0x22   :  { %26 = dma.hbm_to_vmem [thread:$0]  %s2479_s0, 256, %s21_s10, [#allocation4], %s2208_s26, %s2208_s26, %s2209_s27  }
  0x23   :  { %s2146_s3 = scalar_lea.vmem %s45_s12, 512  ;;  %p2151_p2 = scmp.lt.s32.totalorder %s45_s12, %s45_s12 }
  0x24   :  { %p2147_p1 = scmp.ne.s32.totalorder %s45_s12, %s2146_s3  ;;  %p2152_p3 = scmp.lt.s32.totalorder %s2146_s3, %s2146_s3 }
  0x26   :  { %p2153_p4 = por %p2152_p3, %p2151_p2 }
  0x28   :  { %p2154_p5 = pnand %p2153_p4, %p2147_p1 }
  0x2a   :  { %2157 = shalt.err (!%p2154_p5)
}
  0x2b   :  { %50 = dma.hbm_to_vmem [thread:$0]  %s2481_s2, 512, %s45_s12, [#allocation7], %s2208_s26, %s2208_s26, %s2209_s27  }
  0x2c   :  { %s2212_s17 = smov [#allocation11]  }
  0x2d   :  { %s68_s18 = sshll.u32 %s2212_s17, 4  ;;  %s69_s18 = int_to_ptr.vmem [resolvable:$true] %s68_s18 }
  0x2e   :  { %s2166_s19 = scalar_lea.vmem %s69_s18, 512  ;;  %p2171_p7 = scmp.lt.s32.totalorder %s69_s18, %s69_s18 }
  0x2f   :  { %p2167_p6 = scmp.ne.s32.totalorder %s69_s18, %s2166_s19  ;;  %p2172_p8 = scmp.lt.s32.totalorder %s2166_s19, %s2166_s19 }
  0x31   :  { %p2173_p9 = por %p2172_p8, %p2171_p7 }
  0x33   :  { %p2174_p10 = pnand %p2173_p9, %p2167_p6 }
  0x35   :  { %2177 = shalt.err (!%p2174_p10)
}
  0x36   :  { %74 = dma.hbm_to_vmem [thread:$0]  %s2483_s4, 512, %s69_s18, [#allocation10], %s2208_s26, %s2208_s26, %s2209_s27  }
  0x37   :  { %2198 = dma.done.wait [#allocation4], 256  }
  0x38   :  { %2199 = vsyncadd [#allocation4], 4294967040 }
  0x39   :  { %2200 = dma.done.wait [#allocation7], 1024  }
  0x3a   :  { %2201 = vsyncadd [#allocation7], 4294966272 }
  0x3b   :  { %2202 = dma.done.wait [#allocation10], 1024  }
  0x3c   :  { %2203 = vsyncadd [#allocation10], 4294966272  ;;  %v97_v0 = vld [vmem:[#allocation6 + $0x18] sm:$0xff]  ;;  %v96_v2 = vld [vmem:[#allocation6 + $0x10] sm:$0xff]  ;;  %vm98_vm0 = vcmask 261120   ;;  %v2213_v10 = vmov 0.0   ;;  %v340_v21 = vlaneseq }
  0x3d   :  { %v183_v1 = vld [vmem:[#allocation8 + $0x18] sm:$0xff]  ;;  %1907 = vmatprep.subr.mxu0 %v97_v0  ;;  %v182_v3 = vld [vmem:[#allocation8 + $0x10] sm:$0xff]  ;;  %v95_v4 = vld [vmem:[#allocation6 + $0x8] sm:$0xff]  ;;  %vm2214_vm1 = vmmov 0   ;;  %vm345_vm2 = vcmask 64512   ;;  %s2215_s2 = smov 120  }
  0x3e   :  { %1918 = vmatprep.subr.mxu1 %v183_v1  ;;  %1908 = vmatpush3.msra.mxu0 %v97_v0  ;;  %v181_v5 = vld [vmem:[#allocation8 + $0x8] sm:$0xff]  ;;  %v94_v6 = vld [vmem:[#allocation6] sm:$0xff]  ;;  %v92_v8 = vld [vmem:[#allocation3] sm:$0xff]  ;;  %v341_v22 = vshrl.u32 %v340_v21, 7  ;;  %v343_v23 = vand.u32 127, %v340_v21  ;;  %s2216_s4 = smov 112  }
  0x3f   :  { %1919 = vmatpush3.msra.mxu1 %v183_v1  ;;  %1909 = vmatprep.subr.mxu0 %v96_v2  ;;  %v180_v7 = vld [vmem:[#allocation8] sm:$0xff]  ;;  %v93_v9 = vld [vmem:[#allocation3 + $0x8] sm:$0xff]  ;;  %v261_v18 = vld [vmem:[#allocation9 + $0x10] sm:$0xff]  ;;  %s2217_s21 = smov 104   ;;  %s2218_s22 = smov 16   ;;  %vm1014_vm4 = vcmask 130112  }
  0x40   :  { %1920 = vmatprep.subr.mxu1 %v182_v3  ;;  %1910 = vmatpush3.msra.mxu0 %v96_v2  ;;  %v262_v17 = vld [vmem:[#allocation9 + $0x18] sm:$0xff]  ;;  %v260_v19 = vld [vmem:[#allocation9 + $0x8] sm:$0xff]  ;;  %v259_v20 = vld [vmem:[#allocation9] sm:$0xff]  ;;  %vm2324_vm3 = vcmp.le.s32.totalorder %v343_v23, %v341_v22  ;;  %vm1357_vm5 = vcmask 195712   ;;  %s2219_s23 = smov 24   ;;  %vm1700_vm6 = vcmask 261312  }
  0x41   :  { %1921 = vmatpush3.msra.mxu1 %v182_v3  ;;  %1911 = vmatprep.subr.mxu0 %v95_v4  ;;  %s2220_s28 = smov [#allocation12]  }
  0x42   :  { %1922 = vmatprep.subr.mxu1 %v181_v5  ;;  %1912 = vmatpush3.msra.mxu0 %v95_v4  ;;  %s1804_s29 = sshll.u32 %s2220_s28, 4  ;;  %s1805_s29 = int_to_ptr.vmem [resolvable:$true] %s1804_s29 }
  0x43   :  { %1923 = vmatpush3.msra.mxu1 %v181_v5  ;;  %1913 = vmatprep.subr.mxu0 %v94_v6  ;;  %s2178_s30 = scalar_lea.vmem %s1805_s29, 256  ;;  %p2183_p12 = scmp.lt.s32.totalorder %s1805_s29, %s1805_s29 }
  0x44   :  { %1924 = vmatprep.subr.mxu1 %v180_v7  ;;  %1914 = vmatpush3.msra.mxu0 %v94_v6  ;;  %p2179_p11 = scmp.ne.s32.totalorder %s1805_s29, %s2178_s30  ;;  %p2184_p13 = scmp.lt.s32.totalorder %s2178_s30, %s2178_s30 }
  0x45   :  { %1915 = vmatprep.mubr.msk.f32.mxu0 %vm98_vm0, %v92_v8  ;;  %1925 = vmatpush3.msra.mxu1 %v180_v7 }
  0x46   :  { %1926 = vmatprep.mubr.msk.f32.mxu1 %vm98_vm0, %v92_v8  ;;  %1916 = vmatmul.mubr.msk.f32.vlgmr.msra.gmra.mxu0 %vm98_vm0, %v93_v9  ;;  %p2185_p0 = por %p2184_p13, %p2183_p12 }
  0x47   :  { %1927 = vmatmul.mubr.msk.f32.vlgmr.msra.gmra.mxu1 %vm98_vm0, %v93_v9  ;;  %1937 = vmatprep.mubr.msk.f32.mxu0 %vm98_vm0, %v92_v8 }
  0x48   :  { %1940 = vmatprep.subr.mxu1 %v2213_v10  ;;  %1942 = vmatprep.mubr.msk.f32.mxu1 %vm2214_vm1, %v2213_v10  ;;  %p2186_p1 = pnand %p2185_p0, %p2179_p11 }
  0x49   :  { %1929 = vmatprep.subr.mxu0 %v262_v17 }
  0x4a   :  { %1930 = vmatpush3.msra.mxu0 %v262_v17 }
  0x4b   :  { %1931 = vmatprep.subr.mxu0 %v261_v18 }
  0x4c   :  { %1932 = vmatpush3.msra.mxu0 %v261_v18 }
  0x4d   :  { %1933 = vmatprep.subr.mxu0 %v260_v19 }
  0x4e   :  { %1934 = vmatpush3.msra.mxu0 %v260_v19 }
  0x4f   :  { %1935 = vmatprep.subr.mxu0 %v259_v20 }
  0x50   :  { %1936 = vmatpush3.msra.mxu0 %v259_v20 }
  0x51   :  { %1938 = vmatmul.mubr.msk.f32.vlgmr.msra.gmra.mxu0 %vm98_vm0, %v93_v9  ;;  %1960 = vmatprep.subr.mxu0 %v2213_v10 }
  0x52   :  { %1962 = vmatprep.mubr.msk.f32.mxu0 %vm2214_vm1, %v2213_v10 }
 0x106   :  { %v1917_v11 = vpop.f32.mrf.mxu0 }
 0x107   :  { %v2294_v12 = vpop.f32.mrf.mxu1  ;;  %v2313_v16 = vmul.f32 0.35355338, %v1917_v11 }
 0x108   :  { %752 = vrot.lane.b32.xlu1 %v2294_v12, %s2215_s2  ;;  %v171_v13 = vpop.f32.mrf.mxu0 }
 0x109   :  { %v2298_v14 = vpop.f32.mrf.mxu1  ;;  %v2300_v15 = vmul.f32 0.35355338, %v171_v13 }
 0x10a   :  { %1941 = vmatpush3.xpose.msk.msra.mxu1 %vm345_vm2, %v2298_v14 }
 0x10b   :  { %1945 = vmatprep.subr.mxu1 %v2213_v10 }
 0x10c   :  { %672 = vrot.lane.b32.xlu1 %v2300_v15, %s2215_s2 }
 0x10d   :  { %1943 = vmatmul.mubr.msk.f32.vlgmr.msra.gmra.mxu1 %vm345_vm2, %v2300_v15 }
 0x10e   :  { %1946 = vmatpush3.xpose.msk.msra.mxu1 %vm345_vm2, %v2294_v12  ;;  %1947 = vmatprep.mubr.msk.f32.mxu1 %vm2214_vm1, %v2213_v10 }
 0x10f   :  { %1950 = vmatprep.subr.mxu1 %v2213_v10 }
 0x111   :  { %1948 = vmatmul.mubr.msk.f32.vlgmr.msra.gmra.mxu1 %vm345_vm2, %v2313_v16  ;;  %v2343_v46 = vpop.f32.mrf.mxu0 }
 0x112   :  { %1952 = vmatprep.mubr.msk.f32.mxu1 %vm2214_vm1, %v2213_v10 }
 0x113   :  { %v2345_v47 = vpop.f32.mrf.mxu0 }
 0x114   :  { %1951 = vmatpush3.msra.mxu1 %v2345_v47 }
 0x115   :  { %1955 = vmatprep.subr.mxu1 %v2213_v10 }
 0x17a   :  { %v753_v37 = vpop.permute.xlu1 %752 }
 0x17e   :  { %v673_v41 = vpop.permute.xlu1 %672 }
 0x1cd   :  { %v418_v25 = vpop.f32.mrf.mxu1 }
 0x1ce   :  { %v500_v26 = vsel %vm2324_vm3, %v418_v25, -1e+30 }
 0x1cf   :  { %v1944_v27 = vpop.f32.mrf.mxu1  ;;  %v502_v28 = vsel %vm345_vm2, %v500_v26, -inf }
 0x1d0   :  { %503 = vmax.xlane.f32.xlu0 %v502_v28 }
 0x1d1   :  { %v494_v29 = vpop.f32.mrf.mxu1 }
 0x1d2   :  { %v501_v30 = vsel %vm2324_vm3, %v494_v29, -1e+30 }
 0x1d3   :  { %v1949_v31 = vpop.f32.mrf.mxu1  ;;  %v505_v32 = vsel %vm345_vm2, %v501_v30, -inf }
 0x1d4   :  { %506 = vmax.xlane.f32.xlu0 %v505_v32 }
 0x1ea   :  { %674 = vrot.lane.b32.xlu0 %v2298_v14, %s2215_s2 }
 0x259   :  { %v504_v33 = vpop.xlane.xlu0 %503 }
 0x25a   :  { %v508_v34 = vsub.f32 %v500_v26, %v504_v33 }
 0x25c   :  { %v510_v35 = vmul.f32 1.442695, %v508_v34 }
 0x25d   :  { %v507_v36 = vpop.xlane.xlu0 %506 }
 0x25e   :  { %2046 = vpow2.f32 %v510_v35  ;;  %v509_v38 = vsub.f32 %v501_v30, %v507_v36 }
 0x260   :  { %v512_v39 = vmul.f32 1.442695, %v509_v38 }
 0x261   :  { %v675_v40 = vpop.permute.xlu0 %674 }
 0x262   :  { %2048 = vpow2.f32 %v512_v39  ;;  %1961 = vmatpush3.xpose.msk.msra.mxu0 %vm345_vm2, %v675_v40 }
 0x263   :  { %1970 = vmatprep.subr.mxu0 %v2213_v10 }
 0x265   :  { %1963 = vmatmul.mubr.msk.f32.vlgmr.msra.gmra.mxu0 %vm345_vm2, %v673_v41 }
 0x266   :  { %1972 = vmatprep.mubr.msk.f32.mxu0 %vm2214_vm1, %v2213_v10 }
 0x26b   :  { %v2047_v42 = vpop.eup %2046 }
 0x26c   :  { %v514_v43 = vsel %vm345_vm2, %v2047_v42, 0.0 }
 0x26d   :  { %515 = vadd.xlane.f32.xlu1 %v514_v43 }
 0x26f   :  { %v2049_v44 = vpop.eup %2048 }
 0x270   :  { %v517_v45 = vsel %vm345_vm2, %v2049_v44, 0.0 }
 0x271   :  { %518 = vadd.xlane.f32.xlu1 %v517_v45 }
 0x282   :  { %750 = vrot.lane.b32.xlu1 %v2313_v16, %s2215_s2 }
 0x2f6   :  { %v516_v48 = vpop.xlane.xlu1 %515 }
 0x2f7   :  { %2050 = vrcp.f32 %v516_v48 }
 0x2fa   :  { %v519_v49 = vpop.xlane.xlu1 %518 }
 0x2fb   :  { %2052 = vrcp.f32 %v519_v49 }
 0x2fe   :  { %v751_v54 = vpop.permute.xlu1 %750 }
 0x304   :  { %v2051_v50 = vpop.eup %2050 }
 0x305   :  { %v522_v51 = vmul.f32 %v2051_v50, %v2047_v42 }
 0x307   :  { %1953 = vmatmul.mubr.msk.f32.vlgmr.msra.gmra.mxu1 %vm345_vm2, %v522_v51 }
 0x308   :  { %v2053_v52 = vpop.eup %2052  ;;  %1956 = vmatpush3.msra.mxu1 %v2343_v46  ;;  %1957 = vmatprep.mubr.msk.f32.mxu1 %vm2214_vm1, %v2213_v10 }
 0x309   :  { %1965 = vmatprep.subr.mxu1 %v2213_v10  ;;  %v523_v53 = vmul.f32 %v2053_v52, %v2049_v44 }
 0x30b   :  { %1958 = vmatmul.mubr.msk.f32.vlgmr.msra.gmra.mxu1 %vm345_vm2, %v523_v53 }
 0x30c   :  { %1966 = vmatpush3.xpose.msk.msra.mxu1 %vm345_vm2, %v753_v37  ;;  %1967 = vmatprep.mubr.msk.f32.mxu1 %vm2214_vm1, %v2213_v10 }
 0x30d   :  { %1975 = vmatprep.subr.mxu1 %v2213_v10 }
 0x30f   :  { %1968 = vmatmul.mubr.msk.f32.vlgmr.msra.gmra.mxu1 %vm345_vm2, %v751_v54 }
 0x310   :  { %1977 = vmatprep.mubr.msk.f32.mxu1 %vm2214_vm1, %v2213_v10 }
 0x325   :  { %v746_v55 = vpop.f32.mrf.mxu0 }
 0x326   :  { %v828_v56 = vsel %vm2324_vm3, %v746_v55, -1e+30 }
 0x327   :  { %v1964_v57 = vpop.f32.mrf.mxu0  ;;  %v830_v58 = vsel %vm345_vm2, %v828_v56, -inf }
 0x328   :  { %831 = vmax.xlane.f32.xlu0 %v830_v58 }
 0x3b1   :  { %v832_v59 = vpop.xlane.xlu0 %831 }
 0x3b2   :  { %v836_v60 = vsub.f32 %v828_v56, %v832_v59 }
 0x3b4   :  { %v838_v61 = vmul.f32 1.442695, %v836_v60 }
 0x3b6   :  { %2054 = vpow2.f32 %v838_v61 }
 0x3c3   :  { %v2055_v62 = vpop.eup %2054 }
 0x3c4   :  { %v842_v63 = vsel %vm345_vm2, %v2055_v62, 0.0 }
 0x3c5   :  { %843 = vadd.xlane.f32.xlu0 %v842_v63 }
 0x3c7   :  { %v593_v0 = vpop.f32.mrf.mxu1 }
 0x3c8   :  { %670 = vst.msk [vmem:[#allocation2] sm:$0xff] %vm345_vm2, %v593_v0 }
 0x3c9   :  { %v1954_v1 = vpop.f32.mrf.mxu1 }
 0x3cb   :  { %v666_v2 = vpop.f32.mrf.mxu1 }
 0x3cc   :  { %671 = vst.msk [vmem:[#allocation2 + $0x8] sm:$0xff] %vm345_vm2, %v666_v2 }
 0x3cd   :  { %v1959_v3 = vpop.f32.mrf.mxu1 }
 0x3cf   :  { %v824_v4 = vpop.f32.mrf.mxu1 }
 0x3d0   :  { %v829_v5 = vsel %vm2324_vm3, %v824_v4, -1e+30 }
 0x3d1   :  { %v1969_v6 = vpop.f32.mrf.mxu1  ;;  %v833_v7 = vsel %vm345_vm2, %v829_v5, -inf }
 0x3d2   :  { %834 = vmax.xlane.f32.xlu1 %v833_v7 }
 0x3db   :  { %853 = vrot.lane.b32.xlu0 %v2345_v47, %s2215_s2 }
 0x3e3   :  { %930 = vrot.lane.b32.xlu1 %v2343_v46, %s2215_s2 }
 0x3e7   :  { %1019 = vrot.lane.b32.xlu1 %v2298_v14, %s2216_s4 }
 0x3eb   :  { %1097 = vrot.lane.b32.xlu1 %v2294_v12, %s2216_s4 }
 0x3ef   :  { %1095 = vrot.lane.b32.xlu1 %v2313_v16, %s2216_s4 }
 0x44e   :  { %v844_v8 = vpop.xlane.xlu0 %843 }
 0x44f   :  { %2056 = vrcp.f32 %v844_v8 }
 0x452   :  { %v854_v9 = vpop.permute.xlu0 %853 }
 0x453   :  { %1971 = vmatpush3.msra.mxu0 %v854_v9 }
 0x454   :  { %1980 = vmatprep.subr.mxu0 %v2213_v10 }
 0x45b   :  { %v835_v11 = vpop.xlane.xlu1 %834 }
 0x45c   :  { %v2057_v13 = vpop.eup %2056  ;;  %v837_v17 = vsub.f32 %v829_v5, %v835_v11 }
 0x45d   :  { %v850_v18 = vmul.f32 %v2057_v13, %v2055_v62 }
 0x45e   :  { %v840_v19 = vmul.f32 1.442695, %v837_v17 }
 0x45f   :  { %1973 = vmatmul.mubr.msk.f32.vlgmr.msra.gmra.mxu0 %vm345_vm2, %v850_v18  ;;  %v931_v20 = vpop.permute.xlu1 %930 }
 0x460   :  { %2058 = vpow2.f32 %v840_v19  ;;  %1976 = vmatpush3.msra.mxu1 %v931_v20  ;;  %1982 = vmatprep.mubr.msk.f32.mxu0 %vm2214_vm1, %v2213_v10 }
 0x461   :  { %1985 = vmatprep.subr.mxu1 %v2213_v10 }
 0x463   :  { %v1020_v21 = vpop.permute.xlu1 %1019 }
 0x464   :  { %1981 = vmatpush3.xpose.msk.msra.mxu0 %vm345_vm2, %v1020_v21 }
 0x465   :  { %1990 = vmatprep.subr.mxu0 %v2213_v10 }
 0x467   :  { %v1098_v28 = vpop.permute.xlu1 %1097 }
 0x46b   :  { %v1096_v30 = vpop.permute.xlu1 %1095 }
 0x46d   :  { %v2059_v22 = vpop.eup %2058 }
 0x46e   :  { %v845_v23 = vsel %vm345_vm2, %v2059_v22, 0.0 }
 0x46f   :  { %846 = vadd.xlane.f32.xlu0 %v845_v23 }
 0x485   :  { %1017 = vrot.lane.b32.xlu0 %v2300_v15, %s2216_s4 }
 0x4f8   :  { %v847_v25 = vpop.xlane.xlu0 %846 }
 0x4f9   :  { %2060 = vrcp.f32 %v847_v25 }
 0x4fc   :  { %v1018_v26 = vpop.permute.xlu0 %1017 }
 0x4fd   :  { %1983 = vmatmul.mubr.msk.f32.vlgmr.msra.gmra.mxu0 %vm345_vm2, %v1018_v26 }
 0x4fe   :  { %1992 = vmatprep.mubr.msk.f32.mxu0 %vm2214_vm1, %v2213_v10 }
 0x506   :  { %v2061_v27 = vpop.eup %2060 }
 0x507   :  { %v851_v29 = vmul.f32 %v2061_v27, %v2059_v22 }
 0x509   :  { %1978 = vmatmul.mubr.msk.f32.vlgmr.msra.gmra.mxu1 %vm345_vm2, %v851_v29 }
 0x50a   :  { %1986 = vmatpush3.xpose.msk.msra.mxu1 %vm345_vm2, %v1098_v28  ;;  %1987 = vmatprep.mubr.msk.f32.mxu1 %vm2214_vm1, %v2213_v10 }
 0x50b   :  { %1995 = vmatprep.subr.mxu1 %v2213_v10 }
 0x50d   :  { %1988 = vmatmul.mubr.msk.f32.vlgmr.msra.gmra.mxu1 %vm345_vm2, %v1096_v30 }
 0x50e   :  { %1997 = vmatprep.mubr.msk.f32.mxu1 %vm2214_vm1, %v2213_v10 }
 0x51f   :  { %v2404_v31 = vpop.f32.mrf.mxu0 }
 0x521   :  { %v1974_v32 = vpop.f32.mrf.mxu0 }
 0x5bd   :  { %v1091_v33 = vpop.f32.mrf.mxu0 }
 0x5be   :  { %v1173_v34 = vsel %vm2324_vm3, %v1091_v33, -1e+30 }
 0x5bf   :  { %v1984_v35 = vpop.f32.mrf.mxu0  ;;  %v1175_v36 = vsel %vm345_vm2, %v1173_v34, -inf }
 0x5c0   :  { %1176 = vmax.xlane.f32.xlu0 %v1175_v36  ;;  %v1708_v36 = vld [vmem:[#allocation11 + $0x18] sm:$0xff] }
 0x5c9   :  { %v2409_v37 = vpop.f32.mrf.mxu1 }
 0x5cb   :  { %v1979_v38 = vpop.f32.mrf.mxu1 }
 0x5cc   :  { %v1706_v38 = vld [vmem:[#allocation11 + $0x8] sm:$0xff] }
 0x5cd   :  { %v1169_v39 = vpop.f32.mrf.mxu1 }
 0x5ce   :  { %v1174_v40 = vsel %vm2324_vm3, %v1169_v39, -1e+30 }
 0x5cf   :  { %v1989_v41 = vpop.f32.mrf.mxu1  ;;  %v1178_v42 = vsel %vm345_vm2, %v1174_v40, -inf }
 0x5d0   :  { %1179 = vmax.xlane.f32.xlu1 %v1178_v42 }
 0x5e1   :  { %1273 = vrot.lane.b32.xlu1 %v2343_v46, %s2216_s4 }
 0x5e5   :  { %1362 = vrot.lane.b32.xlu1 %v2298_v14, %s2217_s21 }
 0x5e9   :  { %1440 = vrot.lane.b32.xlu1 %v2294_v12, %s2217_s21 }
 0x5ed   :  { %1438 = vrot.lane.b32.xlu1 %v2313_v16, %s2217_s21 }
 0x649   :  { %v1177_v43 = vpop.xlane.xlu0 %1176 }
 0x64a   :  { %v1181_v44 = vsub.f32 %v1173_v34, %v1177_v43 }
 0x64c   :  { %v1183_v45 = vmul.f32 1.442695, %v1181_v44 }
 0x64e   :  { %2062 = vpow2.f32 %v1183_v45 }
 0x659   :  { %v1180_v48 = vpop.xlane.xlu1 %1179 }
 0x65a   :  { %v1182_v12 = vsub.f32 %v1174_v40, %v1180_v48  ;;  %v1705_v40 = vld [vmem:[#allocation11] sm:$0xff] }
 0x65b   :  { %v2063_v49 = vpop.eup %2062 }
 0x65c   :  { %v1187_v50 = vsel %vm345_vm2, %v2063_v49, 0.0  ;;  %v1185_v14 = vmul.f32 1.442695, %v1182_v12 }
 0x65d   :  { %1188 = vadd.xlane.f32.xlu0 %v1187_v50  ;;  %v1274_v51 = vpop.permute.xlu1 %1273 }
 0x65e   :  { %1996 = vmatpush3.msra.mxu1 %v1274_v51  ;;  %2064 = vpow2.f32 %v1185_v14 }
 0x65f   :  { %2005 = vmatprep.subr.mxu1 %v2213_v10 }
 0x661   :  { %v1363_v57 = vpop.permute.xlu1 %1362 }
 0x665   :  { %v1441_v60 = vpop.permute.xlu1 %1440 }
 0x669   :  { %v1439_v62 = vpop.permute.xlu1 %1438 }
 0x66b   :  { %v2065_v16 = vpop.eup %2064 }
 0x66c   :  { %v1190_v52 = vsel %vm345_vm2, %v2065_v16, 0.0 }
 0x673   :  { %1197 = vrot.lane.b32.xlu0 %v2345_v47, %s2216_s4 }
 0x692   :  { %1191 = vadd.xlane.f32.xlu0 %v1190_v52 }
 0x6a8   :  { %1360 = vrot.lane.b32.xlu0 %v2300_v15, %s2217_s21 }
 0x6e6   :  { %v1189_v53 = vpop.xlane.xlu0 %1188 }
 0x6e7   :  { %2066 = vrcp.f32 %v1189_v53 }
 0x6ea   :  { %v1198_v54 = vpop.permute.xlu0 %1197 }
 0x6eb   :  { %1991 = vmatpush3.msra.mxu0 %v1198_v54 }
 0x6ec   :  { %2000 = vmatprep.subr.mxu0 %v2213_v10 }
 0x6f4   :  { %v2067_v55 = vpop.eup %2066 }
 0x6f5   :  { %v1195_v56 = vmul.f32 %v2067_v55, %v2063_v49  ;;  %v1848_v49 = vld [vmem:[%s2484_s5] ss:$0 sm:$0xff] }
 0x6f7   :  { %1993 = vmatmul.mubr.msk.f32.vlgmr.msra.gmra.mxu0 %vm345_vm2, %v1195_v56 }
 0x6f8   :  { %2001 = vmatpush3.xpose.msk.msra.mxu0 %vm345_vm2, %v1363_v57  ;;  %2002 = vmatprep.mubr.msk.f32.mxu0 %vm2214_vm1, %v2213_v10 }
 0x6f9   :  { %2010 = vmatprep.subr.mxu0 %v2213_v10 }
 0x71b   :  { %v1192_v58 = vpop.xlane.xlu0 %1191 }
 0x71c   :  { %2068 = vrcp.f32 %v1192_v58 }
 0x71f   :  { %v1361_v15 = vpop.permute.xlu0 %1360 }
 0x720   :  { %2003 = vmatmul.mubr.msk.f32.vlgmr.msra.gmra.mxu0 %vm345_vm2, %v1361_v15 }
 0x721   :  { %2012 = vmatprep.mubr.msk.f32.mxu0 %vm2214_vm1, %v2213_v10 }
 0x729   :  { %v2069_v59 = vpop.eup %2068 }
 0x72a   :  { %v1196_v61 = vmul.f32 %v2069_v59, %v2065_v16 }
 0x72c   :  { %1998 = vmatmul.mubr.msk.f32.vlgmr.msra.gmra.mxu1 %vm345_vm2, %v1196_v61 }
 0x72d   :  { %2006 = vmatpush3.xpose.msk.msra.mxu1 %vm345_vm2, %v1441_v60  ;;  %2007 = vmatprep.mubr.msk.f32.mxu1 %vm2214_vm1, %v2213_v10 }
 0x72e   :  { %2015 = vmatprep.subr.mxu1 %v2213_v10 }
 0x730   :  { %2008 = vmatmul.mubr.msk.f32.vlgmr.msra.gmra.mxu1 %vm345_vm2, %v1439_v62 }
 0x731   :  { %2017 = vmatprep.mubr.msk.f32.mxu1 %vm2214_vm1, %v2213_v10 }
 0x7b7   :  { %v1269_v63 = vpop.f32.mrf.mxu0 }
 0x7b9   :  { %v1994_v0 = vpop.f32.mrf.mxu0 }
 0x7e0   :  { %v1434_v1 = vpop.f32.mrf.mxu0 }
 0x7e1   :  { %v1516_v2 = vsel %vm2324_vm3, %v1434_v1, -1e+30 }
 0x7e2   :  { %v2004_v3 = vpop.f32.mrf.mxu0  ;;  %v1518_v4 = vsel %vm345_vm2, %v1516_v2, -inf }
 0x7e3   :  { %1519 = vmax.xlane.f32.xlu0 %v1518_v4 }
 0x7ec   :  { %v1345_v5 = vpop.f32.mrf.mxu1 }
 0x7ee   :  { %v1999_v6 = vpop.f32.mrf.mxu1 }
 0x7f0   :  { %v1512_v7 = vpop.f32.mrf.mxu1 }
 0x7f1   :  { %v1517_v8 = vsel %vm2324_vm3, %v1512_v7, -1e+30 }
 0x7f2   :  { %v2009_v9 = vpop.f32.mrf.mxu1  ;;  %v1521_v11 = vsel %vm345_vm2, %v1517_v8, -inf }
 0x7f3   :  { %1522 = vmax.xlane.f32.xlu1 %v1521_v11 }
 0x804   :  { %1616 = vrot.lane.b32.xlu1 %v2343_v46, %s2217_s21 }
 0x808   :  { %1008 = vrot.lane.b32.xlu1 %v2404_v31, %s2209_s27 }
 0x80c   :  { %1010 = vrot.lane.b32.xlu1 %v2409_v37, %s2209_s27 }
 0x810   :  { %1353 = vrot.lane.b32.xlu1 %v1345_v5, %s2218_s22 }
 0x86c   :  { %v1520_v10 = vpop.xlane.xlu0 %1519 }
 0x86d   :  { %v1524_v13 = vsub.f32 %v1516_v2, %v1520_v10 }
 0x86f   :  { %v1526_v17 = vmul.f32 1.442695, %v1524_v13 }
 0x871   :  { %2070 = vpow2.f32 %v1526_v17 }
 0x87c   :  { %v1523_v24 = vpop.xlane.xlu1 %1522 }
 0x87d   :  { %v1525_v18 = vsub.f32 %v1517_v8, %v1523_v24 }
 0x87e   :  { %v2071_v19 = vpop.eup %2070 }
 0x87f   :  { %v1528_v20 = vmul.f32 1.442695, %v1525_v18  ;;  %v1530_v21 = vsel %vm345_vm2, %v2071_v19, 0.0 }
 0x880   :  { %1531 = vadd.xlane.f32.xlu0 %v1530_v21  ;;  %v1617_v46 = vpop.permute.xlu1 %1616 }
 0x881   :  { %2072 = vpow2.f32 %v1528_v20  ;;  %2016 = vmatpush3.msra.mxu1 %v1617_v46 }
 0x884   :  { %v1009_v22 = vpop.permute.xlu1 %1008 }
 0x885   :  { %1015 = vst.msk [vmem:[#allocation2] sm:$0xff] %vm1014_vm4, %v1009_v22 }
 0x888   :  { %v1011_v23 = vpop.permute.xlu1 %1010 }
 0x889   :  { %1016 = vst.msk [vmem:[#allocation2 + $0x8] sm:$0xff] %vm1014_vm4, %v1011_v23 }
 0x88c   :  { %v1354_v25 = vpop.permute.xlu1 %1353 }
 0x88d   :  { %1359 = vst.msk [vmem:[#allocation2 + $0x8] sm:$0xff] %vm1357_vm5, %v1354_v25 }
 0x88e   :  { %v2073_v26 = vpop.eup %2072 }
 0x88f   :  { %v1533_v27 = vsel %vm345_vm2, %v2073_v26, 0.0 }
 0x890   :  { %1534 = vadd.xlane.f32.xlu0 %v1533_v27 }
 0x8a6   :  { %1540 = vrot.lane.b32.xlu0 %v2345_v47, %s2217_s21  ;;  %v1707_v47 = vld [vmem:[#allocation11 + $0x10] sm:$0xff] }
 0x8aa   :  { %1351 = vrot.lane.b32.xlu0 %v1269_v63, %s2218_s22 }
 0x909   :  { %v1532_v28 = vpop.xlane.xlu0 %1531 }
 0x90a   :  { %2074 = vrcp.f32 %v1532_v28 }
 0x917   :  { %v2075_v30 = vpop.eup %2074 }
 0x918   :  { %v1538_v32 = vmul.f32 %v2075_v30, %v2071_v19 }
 0x919   :  { %v1535_v29 = vpop.xlane.xlu0 %1534 }
 0x91a   :  { %2076 = vrcp.f32 %v1535_v29 }
 0x91d   :  { %v1541_v31 = vpop.permute.xlu0 %1540 }
 0x91e   :  { %2011 = vmatpush3.msra.mxu0 %v1541_v31 }
 0x91f   :  { %2013 = vmatmul.mubr.msk.f32.vlgmr.msra.gmra.mxu0 %vm345_vm2, %v1538_v32  ;;  %2020 = vmatprep.subr.mxu0 %v1708_v36 }
 0x920   :  { %2021 = vmatpush3.msra.mxu0 %v1708_v36 }
 0x921   :  { %v1352_v33 = vpop.permute.xlu0 %1351  ;;  %2022 = vmatprep.subr.mxu0 %v1707_v47 }
 0x922   :  { %1358 = vst.msk [vmem:[#allocation2] sm:$0xff] %vm1357_vm5, %v1352_v33  ;;  %2023 = vmatpush3.msra.mxu0 %v1707_v47 }
 0x923   :  { %2024 = vmatprep.subr.mxu0 %v1706_v38 }
 0x924   :  { %2025 = vmatpush3.msra.mxu0 %v1706_v38 }
 0x925   :  { %2026 = vmatprep.subr.mxu0 %v1705_v40 }
 0x926   :  { %2027 = vmatpush3.msra.mxu0 %v1705_v40 }
 0x927   :  { %v2077_v34 = vpop.eup %2076 }
 0x928   :  { %v1539_v35 = vmul.f32 %v2077_v34, %v2073_v26 }
 0x92a   :  { %2018 = vmatmul.mubr.msk.f32.vlgmr.msra.gmra.mxu1 %vm345_vm2, %v1539_v35 }
 0x9df   :  { %v1612_v37 = vpop.f32.mrf.mxu0 }
 0x9e0   :  { %1694 = vrot.lane.b32.xlu0 %v1612_v37, %s2219_s23 }
 0x9e1   :  { %v2014_v39 = vpop.f32.mrf.mxu0 }
 0x9ea   :  { %v1688_v41 = vpop.f32.mrf.mxu1 }
 0x9eb   :  { %1696 = vrot.lane.b32.xlu1 %v1688_v41, %s2219_s23 }
 0x9ec   :  { %v2019_v42 = vpop.f32.mrf.mxu1 }
 0xa52   :  { %v1695_v43 = vpop.permute.xlu0 %1694 }
 0xa53   :  { %1701 = vst.msk [vmem:[#allocation2] sm:$0xff] %vm1700_vm6, %v1695_v43 }
 0xa5a   :  { %v1703_v44 = vld [vmem:[#allocation2] sm:$0xff] }
 0xa5b   :  { %2028 = vmatprep.mubr.msk.f32.mxu0 %vm98_vm0, %v1703_v44 }
 0xa5d   :  { %v1697_v45 = vpop.permute.xlu1 %1696 }
 0xa5e   :  { %1702 = vst.msk [vmem:[#allocation2 + $0x8] sm:$0xff] %vm1700_vm6, %v1697_v45 }
 0xa65   :  { %v1704_v48 = vld [vmem:[#allocation2 + $0x8] sm:$0xff] }
 0xa66   :  { %2029 = vmatmul.mubr.msk.f32.vlgmr.msra.gmra.mxu0 %vm98_vm0, %v1704_v48 }
 0xb26   :  { %v2030_v50 = vpop.f32.mrf.mxu0 }
 0xb27   :  { %v1794_v51 = vadd.f32 %v2030_v50, %v1848_v49 }
 0xb28   :  { %v1788_v12 = vpop.f32.mrf.mxu0 }
 0xb29   :  { %1798 = vst.msk [vmem:[#allocation12 + $0x8] sm:$0xff] %vm98_vm0, %v1794_v51  ;;  %v1789_v14 = vadd.f32 %v1848_v49, %v1788_v12 }
 0xb2b   :  { %1797 = vst.msk [vmem:[#allocation12] sm:$0xff] %vm98_vm0, %v1789_v14 }
 0xb2c   :  { %2189 = shalt.err (!%p2186_p1)
}
 0xb2d   :  { %1810 = dma.vmem_to_hbm [thread:$0]  %s1805_s29, 256, %s2485_s6, [#allocation5], %s2208_s26, %s2208_s26, %s2209_s27  }
 0xb2e   :  { %2204 = dma.done.wait [#allocation5], 256  }
 0xb2f   :  { %2205 = vsyncadd [#allocation5], 4294967040 }
 0xb30   :  { %1814 = vsyncpa [#allocation4], 1 }
 0xb31   :  { %1815 = vsyncpa [#allocation7], 1 }
 0xb32   :  { %1816 = vsyncpa [#allocation10], 1 }
 0xb33   :  { %1817 = vsyncpa [#allocation5], 1 }

</bundles_post_ra>
